<compile_context>
chip_gen: v7x
topology: tpu7x:2x2x1
jax: 0.10.0
libtpu: 0.0.40
codegen_flags: <defaults>
</compile_context>

<pallas_src>
import math

import jax
import jax.numpy as jnp
from jax.experimental import pallas as pl
from jax.experimental.pallas import tpu as pltpu


def _layernorm_kernel(x_ref, scale_ref, shift_ref, o_ref, *, eps):
    # x_ref     : (TM, D) tile of rows, any float dtype
    # scale_ref : (1, D)
    # shift_ref : (1, D)
    # o_ref     : (TM, D)
    x = x_ref[...].astype(jnp.float32)                      # f32 statistics
    mean = jnp.mean(x, axis=-1, keepdims=True)              # XLU lane reduce
    xc = x - mean
    var = jnp.mean(xc * xc, axis=-1, keepdims=True)         # unbiased=False
    inv = jax.lax.rsqrt(var + eps)                          # EUP rsqrt (free slot)
    y = xc * inv
    y = y * scale_ref[...].astype(jnp.float32) + shift_ref[...].astype(jnp.float32)
    o_ref[...] = y.astype(o_ref.dtype)


def layer_norm(x, scale, shift, *, eps=1e-5, block_rows=64):
    """LayerNorm over the last dim of `x`. x: (..., D); scale/shift: (D,)."""
    orig_shape = x.shape
    D = orig_shape[-1]
    M = math.prod(orig_shape[:-1]) if len(orig_shape) > 1 else 1
    x2 = x.reshape(M, D)

    tm = min(block_rows, M)
    grid = (pl.cdiv(M, tm),)

    # Advisory cost hint for XLA scheduling around the custom call.
    cost = pl.CostEstimate(
        flops=8 * M * D,
        transcendentals=M,
        bytes_accessed=2 * M * D * x.dtype.itemsize + 2 * D * scale.dtype.itemsize,
    )

    kernel = lambda xr, sr, br, orr: _layernorm_kernel(xr, sr, br, orr, eps=eps)

    out = pl.pallas_call(
        kernel,
        out_shape=jax.ShapeDtypeStruct((M, D), x.dtype),
        grid=grid,
        in_specs=[
            pl.BlockSpec((tm, D), lambda i: (i, 0)),       # row tile
            pl.BlockSpec((1, D), lambda i: (0, 0)),        # scale, resident
            pl.BlockSpec((1, D), lambda i: (0, 0)),        # shift, resident
        ],
        out_specs=pl.BlockSpec((tm, D), lambda i: (i, 0)),
        compiler_params=pltpu.CompilerParams(
            dimension_semantics=("parallel",),             # shard rows across TCs
        ),
        cost_estimate=cost,
    )(x2, scale.reshape(1, D), shift.reshape(1, D))

    return out.reshape(orig_shape)


def _reference_layernorm(x, scale, shift, eps=1e-5):
    mean = jnp.mean(x, axis=-1, keepdims=True)
    var = jnp.mean((x - mean) ** 2, axis=-1, keepdims=True)
    norm = (x - mean) / jnp.sqrt(var + eps)
    return scale * norm + shift


if __name__ == "__main__":
    # Small but TPU-friendly shapes: lane dim D multiple of 128, and
    # M = B*T = 128 rows -> 2 parallel grid steps of 64 rows each.
    B, T, D = 2, 64, 128

    key = jax.random.PRNGKey(0)
    kx, ks, kb = jax.random.split(key, 3)
    x = jax.random.normal(kx, (B, T, D), dtype=jnp.float32)
    scale = 1.0 + 0.1 * jax.random.normal(ks, (D,), dtype=jnp.float32)
    shift = 0.1 * jax.random.normal(kb, (D,), dtype=jnp.float32)

    out = layer_norm(x, scale, shift)
    out = jax.block_until_ready(out)

    ref = _reference_layernorm(x, scale, shift)
    assert out.shape == x.shape
    assert jnp.allclose(out, ref, atol=1e-4, rtol=1e-4)

    print("KERNEL_OK")
</pallas_src>

<mosaic_0001>
module attributes {stable_mosaic.version = 11 : i64} {
  func.func @_lambda_(%arg0: i32, %arg1: memref<64x128xf32, #tpu.memory_space<vmem>>, %arg2: memref<1x128xf32, #tpu.memory_space<vmem>>, %arg3: memref<1x128xf32, #tpu.memory_space<vmem>>, %arg4: memref<64x128xf32, #tpu.memory_space<vmem>>) attributes {dimension_semantics = [#tpu.dimension_semantics<parallel>], iteration_bounds = array<i64: 2>, scalar_prefetch = 0 : i64, scratch_operands = 0 : i64, tpu.core_type = #tpu.core_type<tc>, window_params = [{transform_indices = @transform_0, window_bounds = array<i64: 64, 128>}, {pipeline_mode = #tpu.pipeline_mode<synchronous>, transform_indices = @transform_1, window_bounds = array<i64: 1, 128>}, {pipeline_mode = #tpu.pipeline_mode<synchronous>, transform_indices = @transform_2, window_bounds = array<i64: 1, 128>}, {transform_indices = @transform_3, window_bounds = array<i64: 64, 128>}]} {
    %c0 = arith.constant 0 : index
    %c0_0 = arith.constant 0 : index
    %0 = vector.load %arg1[%c0, %c0_0] : memref<64x128xf32, #tpu.memory_space<vmem>>, vector<64x128xf32>
    %cst = arith.constant dense<0.000000e+00> : vector<64xf32>
    %1 = vector.multi_reduction <add>, %0, %cst [1] : vector<64x128xf32> to vector<64xf32>
    %2 = vector.shape_cast %1 : vector<64xf32> to vector<64x1xf32>
    %cst_1 = arith.constant 1.280000e+02 : f32
    %3 = vector.broadcast %cst_1 : f32 to vector<64x1xf32>
    %4 = arith.divf %2, %3 : vector<64x1xf32>
    %5 = vector.broadcast %4 : vector<64x1xf32> to vector<64x128xf32>
    %6 = arith.subf %0, %5 : vector<64x128xf32>
    %7 = arith.mulf %6, %6 : vector<64x128xf32>
    %cst_2 = arith.constant dense<0.000000e+00> : vector<64xf32>
    %8 = vector.multi_reduction <add>, %7, %cst_2 [1] : vector<64x128xf32> to vector<64xf32>
    %9 = vector.shape_cast %8 : vector<64xf32> to vector<64x1xf32>
    %cst_3 = arith.constant 1.280000e+02 : f32
    %10 = vector.broadcast %cst_3 : f32 to vector<64x1xf32>
    %11 = arith.divf %9, %10 : vector<64x1xf32>
    %cst_4 = arith.constant 9.99999974E-6 : f32
    %12 = vector.broadcast %cst_4 : f32 to vector<64x1xf32>
    %13 = arith.addf %11, %12 : vector<64x1xf32>
    %14 = math.rsqrt %13 : vector<64x1xf32>
    %15 = vector.broadcast %14 : vector<64x1xf32> to vector<64x128xf32>
    %16 = arith.mulf %6, %15 : vector<64x128xf32>
    %c0_5 = arith.constant 0 : index
    %c0_6 = arith.constant 0 : index
    %17 = vector.load %arg2[%c0_5, %c0_6] : memref<1x128xf32, #tpu.memory_space<vmem>>, vector<1x128xf32>
    %18 = vector.broadcast %17 : vector<1x128xf32> to vector<64x128xf32>
    %19 = arith.mulf %16, %18 : vector<64x128xf32>
    %c0_7 = arith.constant 0 : index
    %c0_8 = arith.constant 0 : index
    %20 = vector.load %arg3[%c0_7, %c0_8] : memref<1x128xf32, #tpu.memory_space<vmem>>, vector<1x128xf32>
    %21 = vector.broadcast %20 : vector<1x128xf32> to vector<64x128xf32>
    %22 = arith.addf %19, %21 : vector<64x128xf32>
    %c0_9 = arith.constant 0 : index
    %c0_10 = arith.constant 0 : index
    %23 = vector.load %arg4[%c0_9, %c0_10] : memref<64x128xf32, #tpu.memory_space<vmem>>, vector<64x128xf32>
    tpu.vector_store %arg4[%c0_9, %c0_10], %22 {strides = array<i32>} : memref<64x128xf32, #tpu.memory_space<vmem>>, vector<64x128xf32>,
    return
  }
  func.func @transform_0(%arg0: i32) -> (i32, i32) {
    %c0_i32 = arith.constant 0 : i32
    %c0_i32_0 = arith.constant 0 : i32
    return %arg0, %c0_i32 : i32, i32
  }
  func.func @transform_1(%arg0: i32) -> (i32, i32) {
    %c0_i32 = arith.constant 0 : i32
    %c0_i32_0 = arith.constant 0 : i32
    %c0_i32_1 = arith.constant 0 : i32
    return %c0_i32, %c0_i32_0 : i32, i32
  }
  func.func @transform_2(%arg0: i32) -> (i32, i32) {
    %c0_i32 = arith.constant 0 : i32
    %c0_i32_0 = arith.constant 0 : i32
    %c0_i32_1 = arith.constant 0 : i32
    return %c0_i32, %c0_i32_0 : i32, i32
  }
  func.func @transform_3(%arg0: i32) -> (i32, i32) {
    %c0_i32 = arith.constant 0 : i32
    %c0_i32_0 = arith.constant 0 : i32
    return %arg0, %c0_i32 : i32, i32
  }
}

</mosaic_0001>

<bundles_post_ra>
// kernel: tpu_custom_call.1
= control target key start
LH: loop header
LB: loop body
LE: loop exit
PB: predicated region body
PF: predicated region fallthrough
CT: control target
= control target key end

     0   :  { %8 = vsyncpa [#allocation3], 0  ;;  %s844_s0 = inlined_call_operand.hbm [shape: f32[128,128], index: 0, kind: input, shape index: {}]   ;;  %s845_s1 = inlined_call_operand.vmem [shape: f32[1,128], index: 1, kind: input, shape index: {}]   ;;  %s846_s2 = inlined_call_operand.vmem [shape: f32[1,128], index: 2, kind: input, shape index: {}]   ;;  %s847_s3 = inlined_call_operand.hbm [shape: f32[128,128], index: 3, kind: output, shape index: {}]  }
   0x1   :  { %10 = vsyncpa [#allocation3 + $0x1], 0 }
   0x2   :  { %11 = vsyncpa [#allocation4], 0 }
   0x3   :  { %13 = vsyncpa [#allocation4 + $0x1], 0  ;;  %s621_s12 = smov 0   ;;  %s623_s13 = smov 0  }
   0x4   :  { %s625_s14 = smov 0   ;;  %s627_s15 = smov 0  }
   0x5 LB: > { %s642_s16 = sadd.s32 4294967295, %s593_s15   ;;  %s413_s17 = sadd.s32 4294967294, %s593_s15   ;;  %s593_s15 = sphi %s627_s15, %s860_s15   ;;  %s589_s14 = sphi %s625_s14, %s859_s14   ;;  %s585_s13 = sphi %s623_s13, %s858_s13   ;;  %s581_s12 = sphi %s621_s12, %s857_s12  }
   0x6   : > { %s646_s18 = sadd.s32 1, %s593_s15   ;;  %s26_s19 = sadd.s32 1, %s589_s14 }
   0x7   : > { %s23_s20 = ssub.s32 %s593_s15, %s646_s18  ;;  %p33_p0 = scmp.ne.s32.totalorder %s589_s14, %s585_s13 }
   0x8   : > { %p24_p1 = scmp.eq.s32.totalorder %s23_s20, 0  ;;  %p34_p2 = scmp.eq.s32.totalorder %s593_s15, 0 }
   0x9   : > { %p39_p3 = scmp.ne.s32.totalorder %s585_s13, %s581_s12  ;;  %p40_p4 = scmp.eq.s32.totalorder %s642_s16, 0 }
   0xa   : > { %s658_s21 = scalar_select %p24_p1, %s589_s14, %s26_s19  }
   0xb   : > { %p660_p5 = por %p34_p2, %p33_p0  ;;  %p664_p6 = por %p40_p4, %p39_p3 }
   0xc   : > { %p105_p7 = scmp.eq.s32.totalorder %s642_s16, 1  ;;  %p111_p8 = scmp.eq.s32.totalorder %s413_s17, 1 }
   0xd   : > { %p443_p10 = scmp.lt.s32.totalorder %s593_s15, 2  ;;  %s137_s26 = sand.u32 1, %s589_s14  }
   0xe   : > { %p671_p11 = por %p105_p7, %p33_p0  ;;  %p675_p12 = por %p111_p8, %p39_p3 }
   0xf   : > { %s429_s27 = sshll.u32 %s593_s15, 10  ;;  %s416_s28 = sshll.u32 %s137_s26, 6 }
  0x10   : > { %s851_s24 = scalar_select %p671_p11, 1, 0 }
  0x11   : > { %s852_s25 = scalar_select %p675_p12, 1, 0 }
  0x12   : > { %s684_s4 = scalar_lea.hbm %s844_s0, %s429_s27  ;;  %s141_s5 = scalar_lea.vmem [#allocation2], %s416_s28 }
  0x13   : > { %s148_s6 = sshll.u32 %s141_s5, 4  ;;  %p688_p13 = pnand %p443_p10, %p660_p5  ;;  %s692_s6 = int_to_ptr.vmem [resolvable:$true] %s148_s6 }
  0x14   : > { %s694_s8 = scalar_lea.sflag [#allocation3], %s137_s26  ;;  %s497_s9 = scalar_lea.hbm %s684_s4, 1024 }
  0x15   : > { %p498_p0 = scmp.ne.s32.totalorder %s684_s4, %s497_s9  ;;  %p499_p1 = pneg %p688_p13 }
  0x16   : > { %s502_s17 = scalar_lea.hbm %s844_s0, 2048  ;;  %p503_p4 = scmp.lt.u32.totalorder %s684_s4, %s844_s0 }
  0x17   : > { %p500_p2 = pnand %p499_p1, %p498_p0  ;;  %p504_p5 = scmp.lt.u32.totalorder %s502_s17, %s497_s9 }
  0x18   : > { %p506_p8 = scmp.lt.u32.totalorder %s497_s9, %s684_s4 }
  0x19   : > { %p501_p3 = pneg %p500_p2  ;;  %p505_p7 = por %p504_p5, %p503_p4 }
  0x1b   : > { %p507_p10 = por %p506_p8, %p505_p7 }
  0x1d   : > { %p508_p9 = pnand %p507_p10, %p501_p3 }
  0x1f   : > { %511 = shalt.err (!%p508_p9)
}
  0x20   : > { %s512_s22 = scalar_lea.vmem %s692_s6, 1024  ;;  %s595_s26 = smov [#allocation2]  }
  0x21   : > { %p513_p0 = scmp.ne.s32.totalorder %s692_s6, %s512_s22  ;;  %s517_s27 = sshll.u32 %s595_s26, 4  ;;  %s518_s27 = int_to_ptr.vmem [resolvable:$false] %s517_s27 }
  0x22   : > { %s519_s28 = scalar_lea.vmem %s518_s27, 2048  ;;  %p520_p11 = scmp.lt.s32.totalorder %s692_s6, %s518_s27 }
  0x23   : > { %p515_p2 = pnand %p513_p0, %p499_p1  ;;  %p521_p4 = scmp.lt.s32.totalorder %s519_s28, %s512_s22 }
  0x25   : > { %p516_p12 = pneg %p515_p2  ;;  %p522_p5 = por %p521_p4, %p520_p11 }
  0x27   : > { %p523_p7 = pnand %p522_p5, %p516_p12 }
  0x29   : > { %526 = shalt.err (!%p523_p7)
}
  0x2a   : > { %s596_s29 = smov 128   ;;  %s597_s30 = smov 8  }
  0x2b   : > { %438 = dma.hbm_to_vmem [thread:$0]  (!%p688_p13), %s684_s4, 1024, %s692_s6, %s694_s8, %s596_s29, %s596_s29, %s597_s30  }
  0x2c   : > { %p419_p9 = scmp.ge.s32.totalorder %s593_s15, 1  ;;  %p156_p1 = scmp.lt.s32.totalorder %s593_s15, 3 }
  0x2e   : > { %p157_p3 = pnand %p419_p9, %p156_p1 }
  0x2f   : > { %s725_s5 = sand.u32 (!%p157_p3), 1, %s585_s13  }
  0x30   : > { %160 = sbr.rel (%p157_p3) target bundleno = 399 (0x18f), region = 32  ;;  %s420_s9 = sshll.u32 (!%p157_p3), %s725_s5, 6 }
  0x31   : > { %s163_s10 = scalar_lea.sflag (!%p157_p3), [#allocation3], %s725_s5  ;;  %s166_s11 = scalar_lea.vmem (!%p157_p3), [#allocation2], %s420_s9 }
  0x37   : > { %572 = dma.done.wait (%p664_p6), %s163_s10, 1024  }
  0x38   : > { %574 = vsyncadd (%p664_p6), %s163_s10, 4294966272  ;;  %v191_v0 = vld [vmem:[%s166_s11] sm:$0xff]  ;;  %v193_v1 = vld [vmem:[%s166_s11 + $0x10] sm:$0xff]  ;;  %s778_s8 = scalar_lea.vmem [#allocation5], %s420_s9  ;;  %s430_s17 = sshll.u32 %s642_s16, 10 }
  0x39   : > { %199 = vadd.xlane.f32.xlu0 %v191_v0  ;;  %203 = vadd.xlane.f32.xlu1 %v193_v1  ;;  %v192_v2 = vld [vmem:[%s166_s11 + $0x8] sm:$0xff]  ;;  %v194_v3 = vld [vmem:[%s166_s11 + $0x18] sm:$0xff]  ;;  %v195_v4 = vld [vmem:[%s166_s11 + $0x20] sm:$0xff]  ;;  %s340_s19 = sshll.u32 %s778_s8, 4  ;;  %s797_s26 = scalar_lea.hbm %s847_s3, %s430_s17  ;;  %s799_s19 = int_to_ptr.vmem [resolvable:$true] %s340_s19 }
  0x3a   : > { %v196_v5 = vld [vmem:[%s166_s11 + $0x28] sm:$0xff]  ;;  %v197_v6 = vld [vmem:[%s166_s11 + $0x30] sm:$0xff]  ;;  %v198_v7 = vld [vmem:[%s166_s11 + $0x38] sm:$0xff]  ;;  %s327_s27 = scalar_lea.sflag [#allocation4], %s725_s5  ;;  %s527_s28 = scalar_lea.vmem %s799_s19, 1024 }
  0x3b   : > { %v422_v60 = vld [vmem:[%s845_s1] ss:$0 sm:$0xff]  ;;  %p528_p6 = scmp.ne.s32.totalorder %s799_s19, %s527_s28  ;;  %p854_p11 = scmp.ne.s32.totalorder %s851_s24, 0 }
  0x3c   : > { %s598_s16 = smov [#allocation5]  }
  0x3d   : > { %201 = vadd.xlane.f32.xlu0 %v192_v2  ;;  %205 = vadd.xlane.f32.xlu1 %v194_v3  ;;  %p529_p12 = pnand %p528_p6, %p854_p11  ;;  %s531_s29 = sshll.u32 %s598_s16, 4  ;;  %s532_s29 = int_to_ptr.vmem [resolvable:$false] %s531_s29 }
  0x3e   : > { %s533_s30 = scalar_lea.vmem %s532_s29, 2048  ;;  %p534_p8 = scmp.lt.s32.totalorder %s799_s19, %s532_s29 }
  0x3f   : > { %p530_p13 = pneg %p529_p12  ;;  %p535_p10 = scmp.lt.s32.totalorder %s533_s30, %s527_s28 }
  0x41   : > { %207 = vadd.xlane.f32.xlu0 %v195_v4  ;;  %209 = vadd.xlane.f32.xlu1 %v196_v5  ;;  %p536_p0 = por %p535_p10, %p534_p8 }
  0x43   : > { %p537_p2 = pnand %p536_p0, %p530_p13 }
  0x45   : > { %211 = vadd.xlane.f32.xlu0 %v197_v6  ;;  %213 = vadd.xlane.f32.xlu1 %v198_v7 }
  0xc6   : > { %v200_v8 = vpop.xlane.xlu0 %199  ;;  %v204_v9 = vpop.xlane.xlu1 %203 }
  0xc7   : > { %v216_v10 = vmul.f32 0.0078125, %v200_v8  ;;  %v218_v11 = vmul.f32 0.0078125, %v204_v9 }
  0xc9   : > { %v735_v12 = vsub.f32 %v191_v0, %v216_v10  ;;  %v737_v13 = vsub.f32 %v193_v1, %v218_v11  ;;  %v423_v1 = vld [vmem:[%s846_s2] ss:$0 sm:$0xff] }
  0xca   : > { %v202_v14 = vpop.xlane.xlu0 %201  ;;  %v206_v15 = vpop.xlane.xlu1 %205 }
  0xcb   : > { %v217_v16 = vmul.f32 0.0078125, %v202_v14  ;;  %v232_v17 = vmul.f32 %v735_v12, %v735_v12  ;;  %v219_v18 = vmul.f32 0.0078125, %v206_v15  ;;  %v234_v21 = vmul.f32 %v737_v13, %v737_v13 }
  0xcd   : > { %v741_v19 = vsub.f32 %v192_v2, %v217_v16  ;;  %240 = vadd.xlane.f32.xlu0 %v232_v17  ;;  %v743_v20 = vsub.f32 %v194_v3, %v219_v18 }
  0xce   : > { %v208_v22 = vpop.xlane.xlu0 %207  ;;  %v210_v23 = vpop.xlane.xlu1 %209 }
  0xcf   : > { %v220_v24 = vmul.f32 0.0078125, %v208_v22  ;;  %v233_v25 = vmul.f32 %v741_v19, %v741_v19  ;;  %v221_v26 = vmul.f32 0.0078125, %v210_v23  ;;  %v235_v29 = vmul.f32 %v743_v20, %v743_v20 }
  0xd1   : > { %v749_v27 = vsub.f32 %v195_v4, %v220_v24  ;;  %244 = vadd.xlane.f32.xlu0 %v234_v21  ;;  %242 = vadd.xlane.f32.xlu1 %v233_v25  ;;  %v751_v28 = vsub.f32 %v196_v5, %v221_v26 }
  0xd2   : > { %v212_v30 = vpop.xlane.xlu0 %211  ;;  %v214_v31 = vpop.xlane.xlu1 %213 }
  0xd3   : > { %v222_v32 = vmul.f32 0.0078125, %v212_v30  ;;  %v236_v33 = vmul.f32 %v749_v27, %v749_v27  ;;  %v223_v34 = vmul.f32 0.0078125, %v214_v31  ;;  %v237_v37 = vmul.f32 %v751_v28, %v751_v28 }
  0xd5   : > { %v757_v35 = vsub.f32 %v197_v6, %v222_v32  ;;  %246 = vadd.xlane.f32.xlu1 %v235_v29  ;;  %248 = vadd.xlane.f32.xlu0 %v236_v33  ;;  %v759_v36 = vsub.f32 %v198_v7, %v223_v34 }
  0xd7   : > { %v238_v38 = vmul.f32 %v757_v35, %v757_v35  ;;  %v239_v39 = vmul.f32 %v759_v36, %v759_v36 }
  0xd9   : > { %250 = vadd.xlane.f32.xlu1 %v237_v37  ;;  %252 = vadd.xlane.f32.xlu0 %v238_v38 }
  0xdd   : > { %254 = vadd.xlane.f32.xlu1 %v239_v39 }
 0x15a   : > { %v241_v40 = vpop.xlane.xlu0 %240 }
 0x15b   : > { %v256_v41 = vmul.f32 0.0078125, %v241_v40 }
 0x15d   : > { %v264_v42 = vadd.f32 1e-05, %v256_v41 }
 0x15e   : > { %v243_v43 = vpop.xlane.xlu1 %242  ;;  %v245_v44 = vpop.xlane.xlu0 %244 }
 0x15f   : > { %481 = vrsqrt.f32 %v264_v42  ;;  %v257_v45 = vmul.f32 0.0078125, %v243_v43  ;;  %v258_v46 = vmul.f32 0.0078125, %v245_v44 }
 0x161   : > { %v265_v47 = vadd.f32 1e-05, %v257_v45  ;;  %v266_v48 = vadd.f32 1e-05, %v258_v46 }
 0x162   : > { %v247_v49 = vpop.xlane.xlu1 %246  ;;  %v249_v50 = vpop.xlane.xlu0 %248 }
 0x163   : > { %483 = vrsqrt.f32 %v265_v47  ;;  %v259_v51 = vmul.f32 0.0078125, %v247_v49  ;;  %v260_v52 = vmul.f32 0.0078125, %v249_v50 }
 0x164   : > { %485 = vrsqrt.f32 %v266_v48 }
 0x165   : > { %v267_v53 = vadd.f32 1e-05, %v259_v51  ;;  %v268_v54 = vadd.f32 1e-05, %v260_v52 }
 0x166   : > { %v251_v55 = vpop.xlane.xlu1 %250  ;;  %v253_v56 = vpop.xlane.xlu0 %252 }
 0x167   : > { %487 = vrsqrt.f32 %v267_v53  ;;  %v261_v57 = vmul.f32 0.0078125, %v251_v55  ;;  %v262_v58 = vmul.f32 0.0078125, %v253_v56 }
 0x168   : > { %489 = vrsqrt.f32 %v268_v54 }
 0x169   : > { %v482_v59 = vpop.eup %481  ;;  %v269_v61 = vadd.f32 1e-05, %v261_v57  ;;  %v270_v62 = vadd.f32 1e-05, %v262_v58 }
 0x16a   : > { %v280_v63 = vmul.f32 %v482_v59, %v735_v12  ;;  %v255_v0 = vpop.xlane.xlu1 %254 }
 0x16b   : > { %491 = vrsqrt.f32 %v269_v61  ;;  %v263_v2 = vmul.f32 0.0078125, %v255_v0 }
 0x16c   : > { %v295_v3 = vmul.f32 %v422_v60, %v280_v63  ;;  %493 = vrsqrt.f32 %v270_v62 }
 0x16d   : > { %v484_v4 = vpop.eup %483  ;;  %v271_v5 = vadd.f32 1e-05, %v263_v2 }
 0x16e   : > { %v486_v6 = vpop.eup %485  ;;  %v310_v7 = vadd.f32 %v423_v1, %v295_v3  ;;  %v281_v8 = vmul.f32 %v484_v4, %v741_v19 }
 0x16f   : > { %v282_v9 = vmul.f32 %v486_v6, %v737_v13  ;;  %495 = vrsqrt.f32 %v271_v5 }
 0x170   : > { %318 = vst [vmem:[%s778_s8] sm:$0xff] %v310_v7  ;;  %v296_v10 = vmul.f32 %v422_v60, %v281_v8 }
 0x171   : > { %v488_v11 = vpop.eup %487  ;;  %v297_v12 = vmul.f32 %v422_v60, %v282_v9 }
 0x172   : > { %v490_v14 = vpop.eup %489  ;;  %v311_v15 = vadd.f32 %v423_v1, %v296_v10  ;;  %v283_v16 = vmul.f32 %v488_v11, %v743_v20 }
 0x173   : > { %v312_v17 = vadd.f32 %v423_v1, %v297_v12  ;;  %v284_v13 = vmul.f32 %v490_v14, %v749_v27 }
 0x174   : > { %319 = vst [vmem:[%s778_s8 + $0x8] sm:$0xff] %v311_v15  ;;  %v298_v18 = vmul.f32 %v422_v60, %v283_v16 }
 0x175   : > { %v492_v19 = vpop.eup %491  ;;  %320 = vst [vmem:[%s778_s8 + $0x10] sm:$0xff] %v312_v17  ;;  %v299_v21 = vmul.f32 %v422_v60, %v284_v13 }
 0x176   : > { %v494_v22 = vpop.eup %493  ;;  %v313_v23 = vadd.f32 %v423_v1, %v298_v18  ;;  %v285_v24 = vmul.f32 %v492_v19, %v751_v28 }
 0x177   : > { %v314_v25 = vadd.f32 %v423_v1, %v299_v21  ;;  %v286_v20 = vmul.f32 %v494_v22, %v757_v35 }
 0x178   : > { %321 = vst [vmem:[%s778_s8 + $0x18] sm:$0xff] %v313_v23  ;;  %v300_v26 = vmul.f32 %v422_v60, %v285_v24 }
 0x179   : > { %v496_v27 = vpop.eup %495  ;;  %322 = vst [vmem:[%s778_s8 + $0x20] sm:$0xff] %v314_v25  ;;  %v301_v29 = vmul.f32 %v422_v60, %v286_v20 }
 0x17a   : > { %v315_v30 = vadd.f32 %v423_v1, %v300_v26  ;;  %v287_v31 = vmul.f32 %v496_v27, %v759_v36 }
 0x17b   : > { %v316_v32 = vadd.f32 %v423_v1, %v301_v29 }
 0x17c   : > { %323 = vst [vmem:[%s778_s8 + $0x28] sm:$0xff] %v315_v30  ;;  %v302_v33 = vmul.f32 %v422_v60, %v287_v31 }
 0x17d   : > { %324 = vst [vmem:[%s778_s8 + $0x30] sm:$0xff] %v316_v32 }
 0x17e   : > { %v317_v28 = vadd.f32 %v423_v1, %v302_v33 }
 0x180   : > { %325 = vst [vmem:[%s778_s8 + $0x38] sm:$0xff] %v317_v28 }
 0x181   : > { %540 = shalt.err (!%p537_p2)
}
 0x182   : > { %s541_s9 = scalar_lea.hbm %s797_s26, 1024  ;;  %s545_s23 = scalar_lea.hbm %s847_s3, 2048 }
 0x183   : > { %p542_p4 = scmp.ne.s32.totalorder %s797_s26, %s541_s9  ;;  %p546_p9 = scmp.lt.u32.totalorder %s797_s26, %s847_s3 }
 0x184   : > { %p547_p1 = scmp.lt.u32.totalorder %s545_s23, %s541_s9  ;;  %p549_p6 = scmp.lt.u32.totalorder %s541_s9, %s797_s26 }
 0x185   : > { %p543_p5 = pnand %p542_p4, %p854_p11 }
 0x186   : > { %p548_p3 = por %p547_p1, %p546_p9 }
 0x187   : > { %p544_p7 = pneg %p543_p5 }
 0x188   : > { %p550_p12 = por %p549_p6, %p548_p3 }
 0x18a   : > { %p551_p13 = pnand %p550_p12, %p544_p7 }
 0x18c   : > { %554 = shalt.err (!%p551_p13)
}
 0x18d   : > { %s599_s7 = smov 128   ;;  %s600_s8 = smov 8  }
 0x18e   : > { %433 = dma.vmem_to_hbm [thread:$0]  (%p854_p11), %s799_s19, 1024, %s797_s26, %s327_s27, %s599_s7, %s599_s7, %s600_s8  }
 0x18f PF: > { %s355_s17 = sand.u32 1, %s581_s12   ;;  %p855_p8 = scmp.ne.s32.totalorder %s852_s25, 0 }
 0x190   : > { %p856_p10 = scmp.ge.s32.totalorder %s593_s15, 2  ;;  %s356_s20 = scalar_lea.sflag [#allocation4], %s355_s17 }
 0x192   : > { %p440_p0 = pnand %p856_p10, %p855_p8 }
 0x194   : > { %576 = dma.done.wait (!%p440_p0), %s356_s20, 1024  }
 0x195   : > { %578 = vsyncadd (!%p440_p0), %s356_s20, 4294966272  ;;  %p16_p2 = scmp.ge.s32.totalorder %s646_s18, 4   ;;  %s857_s12 = smov %s585_s13 }
 0x196   : > { %s858_s13 = smov %s589_s14  ;;  %s859_s14 = smov %s658_s21 }
 0x197   : > { %s860_s15 = smov %s646_s18  ;;  %18 = sbr.rel (!%p16_p2) target bundleno = 5 (0x5), region = 77 }
 0x19e   :  { %361 = vsyncpa [#allocation3], 1 }
 0x19f   :  { %363 = vsyncpa [#allocation3 + $0x1], 1 }
 0x1a0   :  { %364 = vsyncpa [#allocation4], 1 }
 0x1a1   :  { %366 = vsyncpa [#allocation4 + $0x1], 1 }

</bundles_post_ra>
